<compile_context>
chip_gen: v7x
topology: tpu7x:2x2x1
jax: 0.10.0
libtpu: 0.0.40
codegen_flags: <defaults>
</compile_context>

<pallas_src>
import math

import jax
import jax.numpy as jnp
from jax import lax
from jax.experimental import pallas as pl
from jax.experimental.pallas import tpu as pltpu

LANE = 128       # lane width (fast axis)
TM_MAX = 4096    # rows per tile: 4096*128*4B = 2 MiB per f32 input buffer
                 # -> ~8 MiB of double-buffered inputs, ~4 MiB of HBM per step


def _num_tensorcores():
    """2 TensorCores per chip on v7x, 1 on v5e/v6e (perf review: derive, don't hardcode)."""
    try:
        kind = jax.devices()[0].device_kind.lower()
    except Exception:
        return 1
    return 2 if "v7" in kind else 1


def _make_focal_hm_kernel(tm, acc_rows, rows, steps_per_core):
    reduce_tile = acc_rows != tm   # tree-reduce (tm,128) -> (8,128) before accumulating

    def kernel(pred_ref, gt_ref, loss_ref, npos_ref, acc_loss, acc_pos):
        c = pl.program_id(0)
        j = pl.program_id(1)

        @pl.when(j == 0)
        def _():
            acc_loss[...] = jnp.zeros_like(acc_loss)
            acc_pos[...] = jnp.zeros_like(acc_pos)

        pred = pred_ref[...].astype(jnp.float32)
        gt = gt_ref[...].astype(jnp.float32)

        # Shared elementwise terms (needed by both the fast and the masked path).
        one_m_pred = 1.0 - pred
        one_m_gt = 1.0 - gt
        neg_w = one_m_gt * one_m_gt
        neg_w = neg_w * neg_w                      # (1 - gt)^4
        pos_w = one_m_pred * one_m_pred            # (1 - pred)^2
        neg_vw = pred * pred * neg_w               # pred^2 * (1 - gt)^4

        def accumulate(is_pos, is_neg):
            # one log per element; unselected / masked elements never reach log()
            x = jnp.where(is_pos, pred, jnp.where(is_neg, one_m_pred, 1.0))
            w = jnp.where(is_pos, pos_w, jnp.where(is_neg, neg_vw, 0.0))
            contrib = jnp.log(x) * w
            pcnt = is_pos.astype(jnp.float32)
            if reduce_tile:
                contrib = contrib.reshape(tm // 8, 8, LANE).sum(axis=0)
                pcnt = pcnt.reshape(tm // 8, 8, LANE).sum(axis=0)
            acc_loss[...] += contrib
            acc_pos[...] += pcnt

        # Logical (unclamped) block start. A ragged last block or a clamped
        # duplicate block (index_map min()) is never "full" and takes the
        # masked slow path; interior blocks skip the mask work entirely.
        start_row = (c * steps_per_core + j) * tm
        is_full = start_row + tm <= rows

        @pl.when(is_full)                         # mask-free fast path
        def _():
            accumulate(gt == 1.0, gt < 1.0)

        @pl.when(jnp.logical_not(is_full))        # ragged / clamped: mask by row index
        def _():
            row_ids = lax.broadcasted_iota(jnp.int32, (tm, LANE), 0) + start_row
            valid = row_ids < rows
            accumulate(jnp.logical_and(valid, gt == 1.0),
                       jnp.logical_and(valid, gt < 1.0))

        @pl.when(j == steps_per_core - 1)
        def _():
            loss_ref[...] = jnp.full((1, 1, 1), jnp.sum(acc_loss[...]),
                                     dtype=jnp.float32)
            npos_ref[...] = jnp.full((1, 1, 1), jnp.sum(acc_pos[...]),
                                     dtype=jnp.float32)

    return kernel


def _focal_terms_dense(pred, gt):
    """Pure-JAX focal terms; used only for the tiny (<128 elem) non-aligned tail."""
    pred = pred.astype(jnp.float32)
    gt = gt.astype(jnp.float32)
    is_pos = gt == 1.0
    is_neg = gt < 1.0
    one_m_pred = 1.0 - pred
    neg_w = (1.0 - gt) ** 4
    x = jnp.where(is_pos, pred, jnp.where(is_neg, one_m_pred, 1.0))
    w = jnp.where(is_pos, one_m_pred * one_m_pred,
                  jnp.where(is_neg, pred * pred * neg_w, 0.0))
    return jnp.sum(jnp.log(x) * w), jnp.sum(is_pos.astype(jnp.float32))


def focal_loss_for_hm(pred, gt):
    """Pallas-backed focal loss over heatmaps. pred, gt: same shape (e.g. NCHW)."""
    assert pred.shape == gt.shape, (pred.shape, gt.shape)
    total = math.prod(pred.shape) if pred.shape else 1

    pred_f = pred.reshape(-1)   # keep native dtype; cast to f32 in-kernel
    gt_f = gt.reshape(-1)

    main = (total // LANE) * LANE
    tail_loss = jnp.float32(0.0)
    tail_pos = jnp.float32(0.0)
    if main < total:
        # <128 trailing elements: compute in plain JAX instead of jnp.pad-ing the
        # whole flattened array (which would write a full HBM copy of both inputs
        # before a memory-bound kernel).
        tail_loss, tail_pos = _focal_terms_dense(pred_f[main:], gt_f[main:])
        # TODO(synk): the prefix slice below still materializes one copy of the
        # aligned prefix; a fully zero-copy path for non-128-multiple totals would
        # need a 1-D / manual-DMA kernel variant.
        pred_f = pred_f[:main]
        gt_f = gt_f[:main]

    if main == 0:
        return -tail_loss / jnp.maximum(tail_pos, 1.0)

    rows = main // LANE
    pred2 = pred_f.reshape(rows, LANE)
    gt2 = gt_f.reshape(rows, LANE)

    tm = min(TM_MAX, rows)
    # Small (8,128) accumulators whenever the tile can be tree-reduced; fall back
    # to a full-tile accumulator only for tiny inputs where tm == rows % 8 != 0.
    acc_rows = 8 if (tm % 8 == 0 and tm > 8) else tm

    num_blocks = (rows + tm - 1) // tm
    g = _num_tensorcores()
    steps_per_core = (num_blocks + g - 1) // g
    last_block = num_blocks - 1

    def in_map(c, j):
        # Clamp to a valid block; logically-OOB blocks are fully masked in-kernel.
        return (jnp.minimum(c * steps_per_core + j, last_block), 0)

    # Explicit scoped-VMEM budget: 2 inputs x 2 pipeline buffers + accumulators,
    # plus headroom for Mosaic internal scratch / output buffers. Stays well under
    # v7x's 64 MiB physical VMEM and v5e/v6e's 128 MiB.
    vmem_bytes = int(2 * tm * LANE * pred2.dtype.itemsize
                     + 2 * tm * LANE * gt2.dtype.itemsize
                     + 2 * acc_rows * LANE * 4
                     + (8 << 20))

    loss_p, npos_p = pl.pallas_call(
        _make_focal_hm_kernel(tm, acc_rows, rows, steps_per_core),
        out_shape=(jax.ShapeDtypeStruct((g, 1, 1), jnp.float32),
                   jax.ShapeDtypeStruct((g, 1, 1), jnp.float32)),
        grid_spec=pltpu.PrefetchScalarGridSpec(
            num_scalar_prefetch=0,
            grid=(g, steps_per_core),
            in_specs=[pl.BlockSpec((tm, LANE), in_map),
                      pl.BlockSpec((tm, LANE), in_map)],
            out_specs=(pl.BlockSpec((1, 1, 1), lambda c, j: (c, 0, 0)),
                       pl.BlockSpec((1, 1, 1), lambda c, j: (c, 0, 0))),
            scratch_shapes=[pltpu.VMEM((acc_rows, LANE), jnp.float32),
                            pltpu.VMEM((acc_rows, LANE), jnp.float32)]),
        # "parallel" on the leading axis shards it across TensorCores on
        # multi-core chips (v7x, where g == 2); on 1-TC chips g == 1 so it is a
        # no-op. pltpu.CORE_PARALLEL is the explicit alternative if a trace shows
        # the axis is not actually being sharded on v7x.
        compiler_params=pltpu.CompilerParams(
            dimension_semantics=("parallel", "arbitrary"),
            vmem_limit_bytes=vmem_bytes),
    )(pred2, gt2)

    loss_sum = jnp.sum(loss_p) + tail_loss      # pos_loss.sum() + neg_loss.sum()
    num_pos = jnp.sum(npos_p) + tail_pos
    # pos contribution is identically 0 when num_pos == 0, so this single
    # expression covers both branches of the reference.
    return -loss_sum / jnp.maximum(num_pos, 1.0)


class FocalLossHM:
    """JAX/Pallas equivalent of the PyTorch FocalLossHM module (no params)."""

    def __call__(self, out, target):
        return focal_loss_for_hm(out, target)


def _ref_focal_loss_for_hm(pred, gt):
    pred = pred.astype(jnp.float32)
    gt = gt.astype(jnp.float32)
    pos_inds = (gt == 1.0).astype(jnp.float32)
    neg_inds = (gt < 1.0).astype(jnp.float32)
    neg_weights = (1.0 - gt) ** 4
    pos_loss = jnp.log(pred) * (1.0 - pred) ** 2 * pos_inds
    neg_loss = jnp.log(1.0 - pred) * pred ** 2 * neg_weights * neg_inds
    num_pos = pos_inds.sum()
    pos_loss = pos_loss.sum()
    neg_loss = neg_loss.sum()
    return jnp.where(num_pos == 0.0, -neg_loss,
                     -(pos_loss + neg_loss) / jnp.maximum(num_pos, 1.0))


if __name__ == "__main__":
    key = jax.random.PRNGKey(0)
    k1, k2 = jax.random.split(key)

    B, C, H, W = 2, 4, 16, 16
    # predicted heatmap in (0, 1) (post-sigmoid in the real model)
    pred = jax.nn.sigmoid(jax.random.normal(k1, (B, C, H, W), jnp.float32))
    # target heatmap in [0, 1) with a few exact 1.0 peaks
    gt = jax.random.uniform(k2, (B, C, H, W), jnp.float32) * 0.9
    gt = gt.at[:, :, 8, 8].set(1.0)
    gt = gt.at[:, :, 3, 12].set(1.0)

    loss_fn = FocalLossHM()
    loss = loss_fn(pred, gt)
    jax.block_until_ready(loss)

    ref = _ref_focal_loss_for_hm(pred, gt)
    assert jnp.allclose(loss, ref, rtol=1e-5, atol=1e-4), (loss, ref)

    print("KERNEL_OK")
</pallas_src>

<mosaic_0001>
module attributes {stable_mosaic.version = 11 : i64} {
  func.func @kernel(%arg0: i32, %arg1: i32, %arg2: memref<16x128xf32, #tpu.memory_space<vmem>>, %arg3: memref<16x128xf32, #tpu.memory_space<vmem>>, %arg4: memref<1x1x1xf32, #tpu.memory_space<vmem>>, %arg5: memref<1x1x1xf32, #tpu.memory_space<vmem>>, %arg6: memref<8x128xf32, #tpu.memory_space<vmem>>, %arg7: memref<8x128xf32, #tpu.memory_space<vmem>>) attributes {dimension_semantics = [#tpu.dimension_semantics<parallel>, #tpu.dimension_semantics<arbitrary>], iteration_bounds = array<i64: 1, 1>, scalar_prefetch = 0 : i64, scratch_operands = 2 : i64, tpu.core_type = #tpu.core_type<tc>, window_params = [{transform_indices = @transform_0, window_bounds = array<i64: 16, 128>}, {transform_indices = @transform_1, window_bounds = array<i64: 16, 128>}, {transform_indices = @transform_2, window_bounds = array<i64: 1, 1, 1>}, {transform_indices = @transform_3, window_bounds = array<i64: 1, 1, 1>}]} {
    %c0_i32 = arith.constant 0 : i32
    %0 = arith.cmpi eq, %arg1, %c0_i32 : i32
    %1 = arith.extui %0 : i1 to i32
    %c0_i32_0 = arith.constant 0 : i32
    %2 = arith.cmpi ne, %1, %c0_i32_0 : i32
    scf.if %2 {
      %cst_11 = arith.constant 0.000000e+00 : f32
      %27 = vector.broadcast %cst_11 : f32 to vector<8x128xf32>
      %c0_12 = arith.constant 0 : index
      %c0_13 = arith.constant 0 : index
      %28 = vector.load %arg6[%c0_12, %c0_13] : memref<8x128xf32, #tpu.memory_space<vmem>>, vector<8x128xf32>
      tpu.vector_store %arg6[%c0_12, %c0_13], %27 {strides = array<i32>} : memref<8x128xf32, #tpu.memory_space<vmem>>, vector<8x128xf32>,
      %cst_14 = arith.constant 0.000000e+00 : f32
      %29 = vector.broadcast %cst_14 : f32 to vector<8x128xf32>
      %c0_15 = arith.constant 0 : index
      %c0_16 = arith.constant 0 : index
      %30 = vector.load %arg7[%c0_15, %c0_16] : memref<8x128xf32, #tpu.memory_space<vmem>>, vector<8x128xf32>
      tpu.vector_store %arg7[%c0_15, %c0_16], %29 {strides = array<i32>} : memref<8x128xf32, #tpu.memory_space<vmem>>, vector<8x128xf32>,
    } else {
    }
    %c0 = arith.constant 0 : index
    %c0_1 = arith.constant 0 : index
    %3 = vector.load %arg2[%c0, %c0_1] : memref<16x128xf32, #tpu.memory_space<vmem>>, vector<16x128xf32>
    %c0_2 = arith.constant 0 : index
    %c0_3 = arith.constant 0 : index
    %4 = vector.load %arg3[%c0_2, %c0_3] : memref<16x128xf32, #tpu.memory_space<vmem>>, vector<16x128xf32>
    %cst = arith.constant 1.000000e+00 : f32
    %5 = vector.broadcast %cst : f32 to vector<16x128xf32>
    %6 = arith.subf %5, %3 : vector<16x128xf32>
    %cst_4 = arith.constant 1.000000e+00 : f32
    %7 = vector.broadcast %cst_4 : f32 to vector<16x128xf32>
    %8 = arith.subf %7, %4 : vector<16x128xf32>
    %9 = arith.mulf %8, %8 : vector<16x128xf32>
    %10 = arith.mulf %9, %9 : vector<16x128xf32>
    %11 = arith.mulf %6, %6 : vector<16x128xf32>
    %12 = arith.mulf %3, %3 : vector<16x128xf32>
    %13 = arith.mulf %12, %10 : vector<16x128xf32>
    %c1_i32 = arith.constant 1 : i32
    %14 = arith.muli %arg0, %c1_i32 : i32
    %15 = arith.addi %14, %arg1 : i32
    %c16_i32 = arith.constant 16 : i32
    %16 = arith.muli %15, %c16_i32 : i32
    %c16_i32_5 = arith.constant 16 : i32
    %17 = arith.addi %16, %c16_i32_5 : i32
    %c16_i32_6 = arith.constant 16 : i32
    %18 = arith.cmpi sle, %17, %c16_i32_6 : i32
    %19 = arith.extui %18 : i1 to i32
    %c0_i32_7 = arith.constant 0 : i32
    %20 = arith.cmpi ne, %19, %c0_i32_7 : i32
    scf.if %20 {
      %cst_11 = arith.constant 1.000000e+00 : f32
      %27 = vector.broadcast %cst_11 : f32 to vector<16x128xf32>
      %28 = arith.cmpf oeq, %4, %27 : vector<16x128xf32>
      %cst_12 = arith.constant 1.000000e+00 : f32
      %29 = vector.broadcast %cst_12 : f32 to vector<16x128xf32>
      %30 = arith.cmpf olt, %4, %29 : vector<16x128xf32>
      %cst_13 = arith.constant 1.000000e+00 : f32
      %31 = vector.broadcast %cst_13 : f32 to vector<16x128xf32>
      %32 = arith.select %30, %6, %31 : vector<16x128xi1>, vector<16x128xf32>
      %33 = arith.select %28, %3, %32 : vector<16x128xi1>, vector<16x128xf32>
      %cst_14 = arith.constant 0.000000e+00 : f32
      %34 = vector.broadcast %cst_14 : f32 to vector<16x128xf32>
      %35 = arith.select %30, %13, %34 : vector<16x128xi1>, vector<16x128xf32>
      %36 = arith.select %28, %11, %35 : vector<16x128xi1>, vector<16x128xf32>
      %37 = math.log %33 : vector<16x128xf32>
      %38 = arith.mulf %37, %36 : vector<16x128xf32>
      %39 = arith.extui %28 : vector<16x128xi1> to vector<16x128xi32>
      %40 = arith.sitofp %39 : vector<16x128xi32> to vector<16x128xf32>
      %41 = vector.shape_cast %38 : vector<16x128xf32> to vector<2x8x128xf32>
      %cst_15 = arith.constant dense<0.000000e+00> : vector<8x128xf32>
      %42 = vector.multi_reduction <add>, %41, %cst_15 [0] : vector<2x8x128xf32> to vector<8x128xf32>
      %43 = vector.shape_cast %40 : vector<16x128xf32> to vector<2x8x128xf32>
      %cst_16 = arith.constant dense<0.000000e+00> : vector<8x128xf32>
      %44 = vector.multi_reduction <add>, %43, %cst_16 [0] : vector<2x8x128xf32> to vector<8x128xf32>
      %c0_17 = arith.constant 0 : index
      %c0_18 = arith.constant 0 : index
      %45 = vector.load %arg6[%c0_17, %c0_18] : memref<8x128xf32, #tpu.memory_space<vmem>>, vector<8x128xf32>
      %46 = arith.addf %45, %42 : vector<8x128xf32>
      %c0_19 = arith.constant 0 : index
      %c0_20 = arith.constant 0 : index
      %47 = vector.load %arg6[%c0_19, %c0_20] : memref<8x128xf32, #tpu.memory_space<vmem>>, vector<8x128xf32>
      tpu.vector_store %arg6[%c0_19, %c0_20], %46 {strides = array<i32>} : memref<8x128xf32, #tpu.memory_space<vmem>>, vector<8x128xf32>,
      %c0_21 = arith.constant 0 : index
      %c0_22 = arith.constant 0 : index
      %48 = vector.load %arg7[%c0_21, %c0_22] : memref<8x128xf32, #tpu.memory_space<vmem>>, vector<8x128xf32>
      %49 = arith.addf %48, %44 : vector<8x128xf32>
      %c0_23 = arith.constant 0 : index
      %c0_24 = arith.constant 0 : index
      %50 = vector.load %arg7[%c0_23, %c0_24] : memref<8x128xf32, #tpu.memory_space<vmem>>, vector<8x128xf32>
      tpu.vector_store %arg7[%c0_23, %c0_24], %49 {strides = array<i32>} : memref<8x128xf32, #tpu.memory_space<vmem>>, vector<8x128xf32>,
    } else {
    }
    %true = arith.constant true
    %21 = arith.xori %18, %true : i1
    %22 = arith.extui %21 : i1 to i32
    %c0_i32_8 = arith.constant 0 : i32
    %23 = arith.cmpi ne, %22, %c0_i32_8 : i32
    scf.if %23 {
      %27 = tpu.iota {dimensions = array<i32: 0>} : vector<16x128xi32>
      %28 = vector.broadcast %16 : i32 to vector<16x128xi32>
      %29 = arith.addi %27, %28 : vector<16x128xi32>
      %c16_i32_11 = arith.constant 16 : i32
      %30 = vector.broadcast %c16_i32_11 : i32 to vector<16x128xi32>
      %31 = arith.cmpi slt, %29, %30 : vector<16x128xi32>
      %cst_12 = arith.constant 1.000000e+00 : f32
      %32 = vector.broadcast %cst_12 : f32 to vector<16x128xf32>
      %33 = arith.cmpf oeq, %4, %32 : vector<16x128xf32>
      %34 = arith.andi %31, %33 : vector<16x128xi1>
      %cst_13 = arith.constant 1.000000e+00 : f32
      %35 = vector.broadcast %cst_13 : f32 to vector<16x128xf32>
      %36 = arith.cmpf olt, %4, %35 : vector<16x128xf32>
      %37 = arith.andi %31, %36 : vector<16x128xi1>
      %cst_14 = arith.constant 1.000000e+00 : f32
      %38 = vector.broadcast %cst_14 : f32 to vector<16x128xf32>
      %39 = arith.select %37, %6, %38 : vector<16x128xi1>, vector<16x128xf32>
      %40 = arith.select %34, %3, %39 : vector<16x128xi1>, vector<16x128xf32>
      %cst_15 = arith.constant 0.000000e+00 : f32
      %41 = vector.broadcast %cst_15 : f32 to vector<16x128xf32>
      %42 = arith.select %37, %13, %41 : vector<16x128xi1>, vector<16x128xf32>
      %43 = arith.select %34, %11, %42 : vector<16x128xi1>, vector<16x128xf32>
      %44 = math.log %40 : vector<16x128xf32>
      %45 = arith.mulf %44, %43 : vector<16x128xf32>
      %46 = arith.extui %34 : vector<16x128xi1> to vector<16x128xi32>
      %47 = arith.sitofp %46 : vector<16x128xi32> to vector<16x128xf32>
      %48 = vector.shape_cast %45 : vector<16x128xf32> to vector<2x8x128xf32>
      %cst_16 = arith.constant dense<0.000000e+00> : vector<8x128xf32>
      %49 = vector.multi_reduction <add>, %48, %cst_16 [0] : vector<2x8x128xf32> to vector<8x128xf32>
      %50 = vector.shape_cast %47 : vector<16x128xf32> to vector<2x8x128xf32>
      %cst_17 = arith.constant dense<0.000000e+00> : vector<8x128xf32>
      %51 = vector.multi_reduction <add>, %50, %cst_17 [0] : vector<2x8x128xf32> to vector<8x128xf32>
      %c0_18 = arith.constant 0 : index
      %c0_19 = arith.constant 0 : index
      %52 = vector.load %arg6[%c0_18, %c0_19] : memref<8x128xf32, #tpu.memory_space<vmem>>, vector<8x128xf32>
      %53 = arith.addf %52, %49 : vector<8x128xf32>
      %c0_20 = arith.constant 0 : index
      %c0_21 = arith.constant 0 : index
      %54 = vector.load %arg6[%c0_20, %c0_21] : memref<8x128xf32, #tpu.memory_space<vmem>>, vector<8x128xf32>
      tpu.vector_store %arg6[%c0_20, %c0_21], %53 {strides = array<i32>} : memref<8x128xf32, #tpu.memory_space<vmem>>, vector<8x128xf32>,
      %c0_22 = arith.constant 0 : index
      %c0_23 = arith.constant 0 : index
      %55 = vector.load %arg7[%c0_22, %c0_23] : memref<8x128xf32, #tpu.memory_space<vmem>>, vector<8x128xf32>
      %56 = arith.addf %55, %51 : vector<8x128xf32>
      %c0_24 = arith.constant 0 : index
      %c0_25 = arith.constant 0 : index
      %57 = vector.load %arg7[%c0_24, %c0_25] : memref<8x128xf32, #tpu.memory_space<vmem>>, vector<8x128xf32>
      tpu.vector_store %arg7[%c0_24, %c0_25], %56 {strides = array<i32>} : memref<8x128xf32, #tpu.memory_space<vmem>>, vector<8x128xf32>,
    } else {
    }
    %c0_i32_9 = arith.constant 0 : i32
    %24 = arith.cmpi eq, %arg1, %c0_i32_9 : i32
    %25 = arith.extui %24 : i1 to i32
    %c0_i32_10 = arith.constant 0 : i32
    %26 = arith.cmpi ne, %25, %c0_i32_10 : i32
    scf.if %26 {
      %c0_11 = arith.constant 0 : index
      %c0_12 = arith.constant 0 : index
      %27 = vector.load %arg6[%c0_11, %c0_12] : memref<8x128xf32, #tpu.memory_space<vmem>>, vector<8x128xf32>
      %28 = vector.shape_cast %27 : vector<8x128xf32> to vector<1x8x128xf32>
      %cst_13 = arith.constant dense<0.000000e+00> : vector<1xf32>
      %29 = vector.multi_reduction <add>, %28, %cst_13 [1, 2] : vector<1x8x128xf32> to vector<1xf32>
      %30 = vector.shape_cast %29 : vector<1xf32> to vector<1x1x1xf32>
      %31 = vector.extract %30[0, 0, 0] : f32 from vector<1x1x1xf32>
      %32 = vector.broadcast %31 : f32 to vector<1x1x1xf32>
      %c0_14 = arith.constant 0 : index
      %c0_15 = arith.constant 0 : index
      %c0_16 = arith.constant 0 : index
      %33 = vector.load %arg4[%c0_14, %c0_15, %c0_16] : memref<1x1x1xf32, #tpu.memory_space<vmem>>, vector<1x1x1xf32>
      tpu.vector_store %arg4[%c0_14, %c0_15, %c0_16], %32 {strides = array<i32>} : memref<1x1x1xf32, #tpu.memory_space<vmem>>, vector<1x1x1xf32>,
      %c0_17 = arith.constant 0 : index
      %c0_18 = arith.constant 0 : index
      %34 = vector.load %arg7[%c0_17, %c0_18] : memref<8x128xf32, #tpu.memory_space<vmem>>, vector<8x128xf32>
      %35 = vector.shape_cast %34 : vector<8x128xf32> to vector<1x8x128xf32>
      %cst_19 = arith.constant dense<0.000000e+00> : vector<1xf32>
      %36 = vector.multi_reduction <add>, %35, %cst_19 [1, 2] : vector<1x8x128xf32> to vector<1xf32>
      %37 = vector.shape_cast %36 : vector<1xf32> to vector<1x1x1xf32>
      %38 = vector.extract %37[0, 0, 0] : f32 from vector<1x1x1xf32>
      %39 = vector.broadcast %38 : f32 to vector<1x1x1xf32>
      %c0_20 = arith.constant 0 : index
      %c0_21 = arith.constant 0 : index
      %c0_22 = arith.constant 0 : index
      %40 = vector.load %arg5[%c0_20, %c0_21, %c0_22] : memref<1x1x1xf32, #tpu.memory_space<vmem>>, vector<1x1x1xf32>
      tpu.vector_store %arg5[%c0_20, %c0_21, %c0_22], %39 {strides = array<i32>} : memref<1x1x1xf32, #tpu.memory_space<vmem>>, vector<1x1x1xf32>,
    } else {
    }
    return
  }
  func.func @transform_0(%arg0: i32, %arg1: i32) -> (i32, i32) {
    %c1_i32 = arith.constant 1 : i32
    %0 = arith.muli %arg0, %c1_i32 : i32
    %1 = arith.addi %0, %arg1 : i32
    %c0_i32 = arith.constant 0 : i32
    %2 = arith.minsi %1, %c0_i32 : i32
    %c0_i32_0 = arith.constant 0 : i32
    %c0_i32_1 = arith.constant 0 : i32
    return %2, %c0_i32_0 : i32, i32
  }
  func.func @transform_1(%arg0: i32, %arg1: i32) -> (i32, i32) {
    %c1_i32 = arith.constant 1 : i32
    %0 = arith.muli %arg0, %c1_i32 : i32
    %1 = arith.addi %0, %arg1 : i32
    %c0_i32 = arith.constant 0 : i32
    %2 = arith.minsi %1, %c0_i32 : i32
    %c0_i32_0 = arith.constant 0 : i32
    %c0_i32_1 = arith.constant 0 : i32
    return %2, %c0_i32_0 : i32, i32
  }
  func.func @transform_2(%arg0: i32, %arg1: i32) -> (i32, i32, i32) {
    %c0_i32 = arith.constant 0 : i32
    %c0_i32_0 = arith.constant 0 : i32
    %c0_i32_1 = arith.constant 0 : i32
    return %arg0, %c0_i32, %c0_i32_0 : i32, i32, i32
  }
  func.func @transform_3(%arg0: i32, %arg1: i32) -> (i32, i32, i32) {
    %c0_i32 = arith.constant 0 : i32
    %c0_i32_0 = arith.constant 0 : i32
    %c0_i32_1 = arith.constant 0 : i32
    return %arg0, %c0_i32, %c0_i32_0 : i32, i32, i32
  }
}

</mosaic_0001>

<bundles_post_ra>
// kernel: tpu_custom_call.1
= control target key start
LH: loop header
LB: loop body
LE: loop exit
PB: predicated region body
PF: predicated region fallthrough
CT: control target
= control target key end

     0   :  { %9 = vsyncpa [#allocation5], 0  ;;  %s434_s0 = inlined_call_operand.hbm [shape: f32[16,128], index: 0, kind: input, shape index: {}]   ;;  %s435_s1 = inlined_call_operand.hbm [shape: f32[16,128], index: 1, kind: input, shape index: {}]   ;;  %s436_s2 = inlined_call_operand.hbm [shape: f32[1,1,1], index: 2, kind: output, shape index: {0}]   ;;  %s437_s3 = inlined_call_operand.hbm [shape: f32[1,1,1], index: 3, kind: output, shape index: {1}]  }
   0x1   :  { %10 = vsyncpa [#allocation8], 0 }
   0x2   :  { %11 = vsyncpa [#allocation6], 0 }
   0x3   :  { %12 = vsyncpa [#allocation11], 0  ;;  %s347_s12 = smov [#allocation4]   ;;  %s251_s16 = scalar_lea.hbm %s434_s0, 256 }
   0x4   :  { %s24_s13 = sshll.u32 %s347_s12, 4  ;;  %p252_p0 = scmp.ne.s32.totalorder %s434_s0, %s251_s16  ;;  %s25_s13 = int_to_ptr.vmem [resolvable:$true] %s24_s13 }
   0x5   :  { %p255_p1 = scmp.lt.u32.totalorder %s251_s16, %s434_s0 }
   0x7   :  { %p257_p2 = pnand %p255_p1, %p252_p0 }
   0x9   :  { %260 = shalt.err (!%p257_p2)
}
   0xa   :  { %s261_s21 = scalar_lea.vmem %s25_s13, 256  ;;  %p266_p4 = scmp.lt.s32.totalorder %s25_s13, %s25_s13 }
   0xb   :  { %p262_p3 = scmp.ne.s32.totalorder %s25_s13, %s261_s21  ;;  %p267_p5 = scmp.lt.s32.totalorder %s261_s21, %s261_s21 }
   0xd   :  { %p268_p6 = por %p267_p5, %p266_p4 }
   0xf   :  { %p269_p7 = pnand %p268_p6, %p262_p3 }
  0x11   :  { %272 = shalt.err (!%p269_p7)
}
  0x12   :  { %s348_s22 = smov 128   ;;  %s349_s23 = smov 8  }
  0x13   :  { %30 = dma.hbm_to_vmem [thread:$0]  %s434_s0, 256, %s25_s13, [#allocation5], %s348_s22, %s348_s22, %s349_s23  }
  0x14   :  { %s350_s26 = smov [#allocation7]   ;;  %s273_s30 = scalar_lea.hbm %s435_s1, 256 }
  0x15   :  { %s42_s27 = sshll.u32 %s350_s26, 4  ;;  %p274_p8 = scmp.ne.s32.totalorder %s435_s1, %s273_s30  ;;  %s43_s27 = int_to_ptr.vmem [resolvable:$true] %s42_s27 }
  0x16   :  { %p277_p9 = scmp.lt.u32.totalorder %s273_s30, %s435_s1 }
  0x18   :  { %p279_p10 = pnand %p277_p9, %p274_p8 }
  0x1a   :  { %282 = shalt.err (!%p279_p10)
}
  0x1b   :  { %s283_s8 = scalar_lea.vmem %s43_s27, 256  ;;  %p288_p12 = scmp.lt.s32.totalorder %s43_s27, %s43_s27 }
  0x1c   :  { %p284_p11 = scmp.ne.s32.totalorder %s43_s27, %s283_s8  ;;  %p289_p13 = scmp.lt.s32.totalorder %s283_s8, %s283_s8 }
  0x1e   :  { %p290_p0 = por %p289_p13, %p288_p12 }
  0x20   :  { %p291_p1 = pnand %p290_p0, %p284_p11 }
  0x22   :  { %294 = shalt.err (!%p291_p1)
}
  0x23   :  { %48 = dma.hbm_to_vmem [thread:$0]  %s435_s1, 256, %s43_s27, [#allocation8], %s348_s22, %s348_s22, %s349_s23  }
  0x24   :  { %339 = dma.done.wait [#allocation5], 256  }
  0x25   :  { %340 = vsyncadd [#allocation5], 4294967040 }
  0x26   :  { %341 = dma.done.wait [#allocation8], 256  }
  0x27   :  { %342 = vsyncadd [#allocation8], 4294967040  ;;  %v69_v0 = vld [vmem:[#allocation4] sm:$0xff]  ;;  %v70_v1 = vld [vmem:[#allocation4 + $0x8] sm:$0xff]  ;;  %v351_v32 = vmov 0.0   ;;  %s352_s1 = smov [#allocation9]  }
  0x28   :  { %v71_v2 = vld [vmem:[#allocation7] sm:$0xff]  ;;  %v72_v3 = vld [vmem:[#allocation7 + $0x8] sm:$0xff]  ;;  %v73_v4 = vsub.f32 1.0, %v69_v0  ;;  %v74_v5 = vsub.f32 1.0, %v70_v1  ;;  %v83_v12 = vmul.f32 %v69_v0, %v69_v0  ;;  %v84_v16 = vmul.f32 %v70_v1, %v70_v1  ;;  %s204_s10 = sshll.u32 %s352_s1, 4  ;;  %s353_s12 = smov [#allocation10]   ;;  %s205_s10 = int_to_ptr.vmem [resolvable:$true] %s204_s10 }
  0x29   :  { %v75_v6 = vsub.f32 1.0, %v71_v2  ;;  %v76_v7 = vsub.f32 1.0, %v72_v3  ;;  %vm94_vm0 = vcmp.eq.f32.partialorder %v71_v2, 1.0  ;;  %vm95_vm1 = vcmp.eq.f32.partialorder %v72_v3, 1.0  ;;  %s214_s13 = sshll.u32 %s353_s12, 4  ;;  %s295_s14 = scalar_lea.vmem %s205_s10, 16  ;;  %s215_s13 = int_to_ptr.vmem [resolvable:$true] %s214_s13 }
  0x2a   :  { %vm96_vm2 = vcmp.lt.f32.partialorder %v71_v2, 1.0  ;;  %vm97_vm3 = vcmp.lt.f32.partialorder %v72_v3, 1.0  ;;  %v81_v20 = vmul.f32 %v73_v4, %v73_v4  ;;  %v82_v21 = vmul.f32 %v74_v5, %v74_v5  ;;  %p296_p2 = scmp.ne.s32.totalorder %s205_s10, %s295_s14  ;;  %s299_s15 = scalar_lea.vmem %s205_s10, 32 }
  0x2b   :  { %v77_v8 = vmul.f32 %v75_v6, %v75_v6  ;;  %v78_v9 = vmul.f32 %v76_v7, %v76_v7  ;;  %v98_v10 = vsel %vm96_vm2, %v73_v4, 1.0  ;;  %v99_v13 = vsel %vm97_vm3, %v74_v5, 1.0  ;;  %p300_p3 = scmp.lt.s32.totalorder %s205_s10, %s205_s10  ;;  %p301_p4 = scmp.lt.s32.totalorder %s299_s15, %s295_s14 }
  0x2c   :  { %v100_v14 = vsel %vm94_vm0, %v69_v0, %v98_v10  ;;  %v101_v17 = vsel %vm95_vm1, %v70_v1, %v99_v13  ;;  %v232_v33 = vsel %vm94_vm0, 1.0, %v351_v32  ;;  %v233_v34 = vsel %vm95_vm1, 1.0, %v351_v32 }
  0x2d   :  { %v79_v11 = vmul.f32 %v77_v8, %v77_v8  ;;  %v80_v15 = vmul.f32 %v78_v9, %v78_v9  ;;  %247 = vlog2.f32 %v100_v14  ;;  %v117_v36 = vadd.f32 %v233_v34, %v232_v33  ;;  %p302_p5 = por %p301_p4, %p300_p3 }
  0x2e   :  { %249 = vlog2.f32 %v101_v17  ;;  %vm184_vm4 = vcmask 0  }
  0x2f   :  { %v85_v18 = vmul.f32 %v83_v12, %v79_v11  ;;  %v86_v19 = vmul.f32 %v84_v16, %v80_v15  ;;  %p303_p6 = pnand %p302_p5, %p296_p2 }
  0x31   :  { %v102_v22 = vsel %vm96_vm2, %v85_v18, 0.0  ;;  %v103_v23 = vsel %vm97_vm3, %v86_v19, 0.0 }
  0x32   :  { %v104_v25 = vsel %vm94_vm0, %v81_v20, %v102_v22  ;;  %v105_v27 = vsel %vm95_vm1, %v82_v21, %v103_v23 }
  0x37   :  { %v248_v24 = vpop.eup %247 }
  0x38   :  { %v250_v26 = vpop.eup %249  ;;  %v107_v28 = vmul.f32 0.6931472, %v248_v24 }
  0x39   :  { %v109_v29 = vmul.f32 0.6931472, %v250_v26 }
  0x3a   :  { %v110_v30 = vmul.f32 %v107_v28, %v104_v25 }
  0x3b   :  { %v111_v31 = vmul.f32 %v109_v29, %v105_v27 }
  0x3d   :  { %v116_v35 = vadd.f32 %v111_v31, %v110_v30 }
  0x3f   :  { %174 = vadd.xlane.f32.xlu0 %v116_v35 }
  0x43   :  { %187 = vadd.xlane.f32.xlu0 %v117_v36 }
  0xcc   :  { %v175_v37 = vpop.xlane.xlu0 %174 }
  0xcd   :  { %v176_v38 = vrot.slane %v175_v37, 4 }
  0xcf   :  { %v177_v39 = vadd.f32 %v176_v38, %v175_v37 }
  0xd0   :  { %v188_v40 = vpop.xlane.xlu0 %187 }
  0xd1   :  { %v178_v41 = vrot.slane %v177_v39, 2  ;;  %v189_v42 = vrot.slane %v188_v40, 4 }
  0xd3   :  { %v190_v43 = vadd.f32 %v189_v42, %v188_v40  ;;  %v179_v44 = vadd.f32 %v178_v41, %v177_v39 }
  0xd5   :  { %v191_v45 = vrot.slane %v190_v43, 2  ;;  %v180_v46 = vrot.slane %v179_v44, 1 }
  0xd7   :  { %v192_v47 = vadd.f32 %v191_v45, %v190_v43  ;;  %v181_v48 = vadd.f32 %v180_v46, %v179_v44 }
  0xd9   :  { %236 = vpush %v181_v48  ;;  %v193_v49 = vrot.slane %v192_v47, 1 }
  0xdb   :  { %v194_v50 = vadd.f32 %v193_v49, %v192_v47 }
  0xdd   :  { %238 = vpush %v194_v50 }
 0x10a   :  { %s237_s11 = spop %236 }
 0x10b   :  { %v183_v51 = vstv %s237_s11 }
 0x10c   :  { %185 = vst.msk [vmem:[#allocation9] sm:$0x1] %vm184_vm4, %v183_v51 }
 0x10d   :  { %306 = shalt.err (!%p303_p6)
}
 0x10e   :  { %s307_s18 = scalar_lea.hbm %s436_s2, 16 }
 0x10f   :  { %p308_p7 = scmp.ne.s32.totalorder %s436_s2, %s307_s18  ;;  %p311_p8 = scmp.lt.u32.totalorder %s307_s18, %s436_s2 }
 0x111   :  { %p313_p9 = pnand %p311_p8, %p308_p7 }
 0x113   :  { %316 = shalt.err (!%p313_p9)
}
 0x114   :  { %207 = dma.vmem_to_hbm [thread:$0]  %s205_s10, 16, %s436_s2, [#allocation6]  }
 0x115   :  { %s239_s25 = spop %238  ;;  %s317_s26 = scalar_lea.vmem %s215_s13, 16 }
 0x116   :  { %v196_v52 = vstv %s239_s25  ;;  %p318_p10 = scmp.ne.s32.totalorder %s215_s13, %s317_s26  ;;  %s321_s27 = scalar_lea.vmem %s215_s13, 32 }
 0x117   :  { %197 = vst.msk [vmem:[#allocation10] sm:$0x1] %vm184_vm4, %v196_v52  ;;  %p322_p11 = scmp.lt.s32.totalorder %s215_s13, %s215_s13  ;;  %p323_p12 = scmp.lt.s32.totalorder %s321_s27, %s317_s26 }
 0x119   :  { %p324_p13 = por %p323_p12, %p322_p11 }
 0x11b   :  { %p325_p0 = pnand %p324_p13, %p318_p10 }
 0x11d   :  { %328 = shalt.err (!%p325_p0)
}
 0x11e   :  { %s329_s30 = scalar_lea.hbm %s437_s3, 16 }
 0x11f   :  { %p330_p1 = scmp.ne.s32.totalorder %s437_s3, %s329_s30  ;;  %p333_p2 = scmp.lt.u32.totalorder %s329_s30, %s437_s3 }
 0x121   :  { %p335_p3 = pnand %p333_p2, %p330_p1 }
 0x123   :  { %338 = shalt.err (!%p335_p3)
}
 0x124   :  { %217 = dma.vmem_to_hbm [thread:$0]  %s215_s13, 16, %s437_s3, [#allocation11]  }
 0x125   :  { %343 = dma.done.wait [#allocation6], 16  }
 0x126   :  { %344 = vsyncadd [#allocation6], 4294967280 }
 0x127   :  { %345 = dma.done.wait [#allocation11], 16  }
 0x128   :  { %346 = vsyncadd [#allocation11], 4294967280 }
 0x129   :  { %224 = vsyncpa [#allocation5], 1 }
 0x12a   :  { %225 = vsyncpa [#allocation8], 1 }
 0x12b   :  { %226 = vsyncpa [#allocation6], 1 }
 0x12c   :  { %227 = vsyncpa [#allocation11], 1 }

</bundles_post_ra>
